<compile_context>
chip_gen: v6e
topology: v6e:2x2x1
jax: 0.10.0
libtpu: 0.0.40
codegen_flags: <defaults>
</compile_context>

<pallas_src>
import functools

import jax
import jax.numpy as jnp
from jax.experimental import pallas as pl
from jax.experimental.pallas import tpu as pltpu


def _loss_mse_kernel(labels_ref, outs_ref, partial_ref, *, batch_size, tile_rows):
    """One batch tile: emit this tile's partial loss sum (lane-replicated)."""
    i = pl.program_id(0)

    labels = labels_ref[...].astype(jnp.float32)
    outs = outs_ref[...].astype(jnp.float32)

    alphas = outs + 1.0
    S = jnp.sum(alphas, axis=1, keepdims=True)              # [TB, 1]
    # Column-wise reciprocals (one per row) instead of two full-tile divides.
    inv_S = pl.reciprocal(S)                                  # exact -> matches reference tol
    inv_1pS = pl.reciprocal(1.0 + S)
    probs = alphas * inv_S
    err = (labels - probs) ** 2
    var = probs * (1.0 - probs) * inv_1pS
    per_row = jnp.sum(err + var, axis=1, keepdims=True)      # [TB, 1]

    # Zero out padded tail rows (global row index >= true batch size).
    row_ids = i * tile_rows + jax.lax.broadcasted_iota(jnp.int32, (tile_rows, 1), 0)
    per_row = jnp.where(row_ids < batch_size, per_row, 0.0)

    partial = jnp.sum(per_row)
    # Lane-dense (1, 1, 128) output row; the wrapper reads lane 0.
    partial_ref[...] = jnp.full(partial_ref.shape, partial, dtype=jnp.float32)


def _choose_tile_rows(batch, num_classes, *, bytes_per_elem=4, target_tile_bytes=4 << 20):
    # ~4 MiB per input tile (2 inputs x 2 pipeline buffers ~= 16 MiB VMEM),
    # rows a multiple of 8 (f32 sublane), never larger than the 8-padded batch.
    tb = max(8, (target_tile_bytes // (num_classes * bytes_per_elem)) // 8 * 8)
    batch_pad8 = ((batch + 7) // 8) * 8
    return min(tb, batch_pad8)


def loss_mse(labels, outs, *, tile_rows=None):
    """Pallas TPU implementation of LossMSE.forward(labels, outs)."""
    assert labels.shape == outs.shape and labels.ndim == 2
    B, C = labels.shape
    TB = tile_rows if tile_rows is not None else _choose_tile_rows(B, C)
    num_tiles = int(pl.cdiv(B, TB))
    B_pad = num_tiles * TB
    if B_pad != B:  # zero-pad the tail; kernel masks those rows out of the sum
        labels = jnp.pad(labels, ((0, B_pad - B), (0, 0)))
        outs = jnp.pad(outs, ((0, B_pad - B), (0, 0)))

    kernel = functools.partial(_loss_mse_kernel, batch_size=B, tile_rows=TB)

    # NOTE: with C < 128 the lane dim is under-utilized; a wrapper-side repack
    # to a 128-dense lane layout is possible but not worth it at these sizes.
    partials = pl.pallas_call(
        kernel,
        out_shape=jax.ShapeDtypeStruct((num_tiles, 1, 128), jnp.float32),
        grid_spec=pltpu.PrefetchScalarGridSpec(
            num_scalar_prefetch=0,
            grid=(num_tiles,),
            in_specs=[
                pl.BlockSpec((TB, C), lambda i: (i, 0)),
                pl.BlockSpec((TB, C), lambda i: (i, 0)),
            ],
            out_specs=pl.BlockSpec((1, 1, 128), lambda i: (i, 0, 0)),
        ),
        compiler_params=pltpu.CompilerParams(
            # Independent per-tile partial sums -> grid axis is parallel
            # (lets both v7x TensorCores stream half the batch each).
            dimension_semantics=("parallel",),
            vmem_limit_bytes=32 << 20,
        ),
    )(labels, outs)

    # Final mean over the TRUE batch size, done in the wrapper.
    return jnp.sum(partials[:, 0, 0]) / B


def _reference(labels, outs):
    alphas = outs + 1.0
    S = jnp.sum(alphas, axis=1).reshape(-1, 1)
    probs = alphas / S
    return jnp.mean(jnp.sum((labels - probs) ** 2 + probs * (1 - probs) / (1 + S), axis=1))


if __name__ == "__main__":
    key = jax.random.PRNGKey(0)
    k1, k2, k3, k4 = jax.random.split(key, 4)

    # Small shapes consistent with the module: [batch, num_classes].
    B, C = 8, 32
    outs = jax.nn.softplus(jax.random.normal(k1, (B, C), dtype=jnp.float32))
    labels = jax.nn.one_hot(jax.random.randint(k2, (B,), 0, C), C, dtype=jnp.float32)

    loss = loss_mse(labels, outs)
    jax.block_until_ready(loss)
    ref = _reference(labels, outs)
    assert jnp.allclose(loss, ref, rtol=1e-5, atol=1e-6), (loss, ref)

    # Exercise the tiled + tail-masking path (B not a multiple of the tile).
    B2, C2 = 20, 32
    outs2 = jax.nn.softplus(jax.random.normal(k3, (B2, C2), dtype=jnp.float32))
    labels2 = jax.nn.one_hot(jax.random.randint(k4, (B2,), 0, C2), C2, dtype=jnp.float32)

    loss2 = loss_mse(labels2, outs2, tile_rows=8)
    jax.block_until_ready(loss2)
    ref2 = _reference(labels2, outs2)
    assert jnp.allclose(loss2, ref2, rtol=1e-5, atol=1e-6), (loss2, ref2)

    print("KERNEL_OK")
</pallas_src>

<mosaic_0001>
module attributes {stable_mosaic.version = 11 : i64} {
  func.func @_loss_mse_kernel(%arg0: i32, %arg1: memref<8x32xf32, #tpu.memory_space<vmem>>, %arg2: memref<8x32xf32, #tpu.memory_space<vmem>>, %arg3: memref<1x1x128xf32, #tpu.memory_space<vmem>>) attributes {dimension_semantics = [#tpu.dimension_semantics<parallel>], iteration_bounds = array<i64: 1>, scalar_prefetch = 0 : i64, scratch_operands = 0 : i64, tpu.core_type = #tpu.core_type<tc>, window_params = [{transform_indices = @transform_0, window_bounds = array<i64: 8, 32>}, {transform_indices = @transform_1, window_bounds = array<i64: 8, 32>}, {transform_indices = @transform_2, window_bounds = array<i64: 1, 1, 128>}]} {
    %c0 = arith.constant 0 : index
    %c0_0 = arith.constant 0 : index
    %0 = vector.load %arg1[%c0, %c0_0] : memref<8x32xf32, #tpu.memory_space<vmem>>, vector<8x32xf32>
    %c0_1 = arith.constant 0 : index
    %c0_2 = arith.constant 0 : index
    %1 = vector.load %arg2[%c0_1, %c0_2] : memref<8x32xf32, #tpu.memory_space<vmem>>, vector<8x32xf32>
    %cst = arith.constant 1.000000e+00 : f32
    %2 = vector.broadcast %cst : f32 to vector<8x32xf32>
    %3 = arith.addf %1, %2 : vector<8x32xf32>
    %cst_3 = arith.constant dense<0.000000e+00> : vector<8xf32>
    %4 = vector.multi_reduction <add>, %3, %cst_3 [1] : vector<8x32xf32> to vector<8xf32>
    %5 = vector.shape_cast %4 : vector<8xf32> to vector<8x1xf32>
    %6 = tpu.reciprocal %5 : vector<8x1xf32> -> vector<8x1xf32>
    %cst_4 = arith.constant 1.000000e+00 : f32
    %7 = vector.broadcast %cst_4 : f32 to vector<8x1xf32>
    %8 = arith.addf %7, %5 : vector<8x1xf32>
    %9 = tpu.reciprocal %8 : vector<8x1xf32> -> vector<8x1xf32>
    %10 = vector.broadcast %6 : vector<8x1xf32> to vector<8x32xf32>
    %11 = arith.mulf %3, %10 : vector<8x32xf32>
    %12 = arith.subf %0, %11 : vector<8x32xf32>
    %13 = arith.mulf %12, %12 : vector<8x32xf32>
    %cst_5 = arith.constant 1.000000e+00 : f32
    %14 = vector.broadcast %cst_5 : f32 to vector<8x32xf32>
    %15 = arith.subf %14, %11 : vector<8x32xf32>
    %16 = arith.mulf %11, %15 : vector<8x32xf32>
    %17 = vector.broadcast %9 : vector<8x1xf32> to vector<8x32xf32>
    %18 = arith.mulf %16, %17 : vector<8x32xf32>
    %19 = arith.addf %13, %18 : vector<8x32xf32>
    %cst_6 = arith.constant dense<0.000000e+00> : vector<8xf32>
    %20 = vector.multi_reduction <add>, %19, %cst_6 [1] : vector<8x32xf32> to vector<8xf32>
    %21 = vector.shape_cast %20 : vector<8xf32> to vector<8x1xf32>
    %c8_i32 = arith.constant 8 : i32
    %22 = arith.muli %arg0, %c8_i32 : i32
    %23 = tpu.iota {dimensions = array<i32: 0>} : vector<8x1xi32>
    %24 = vector.broadcast %22 : i32 to vector<8x1xi32>
    %25 = arith.addi %24, %23 : vector<8x1xi32>
    %c8_i32_7 = arith.constant 8 : i32
    %26 = vector.broadcast %c8_i32_7 : i32 to vector<8x1xi32>
    %27 = arith.cmpi slt, %25, %26 : vector<8x1xi32>
    %cst_8 = arith.constant 0.000000e+00 : f32
    %28 = vector.broadcast %cst_8 : f32 to vector<8x1xf32>
    %29 = arith.select %27, %21, %28 : vector<8x1xi1>, vector<8x1xf32>
    %30 = vector.shape_cast %29 : vector<8x1xf32> to vector<1x8x1xf32>
    %cst_9 = arith.constant dense<0.000000e+00> : vector<1xf32>
    %31 = vector.multi_reduction <add>, %30, %cst_9 [1, 2] : vector<1x8x1xf32> to vector<1xf32>
    %32 = vector.shape_cast %31 : vector<1xf32> to vector<1x1x1xf32>
    %33 = vector.extract %32[0, 0, 0] : f32 from vector<1x1x1xf32>
    %34 = vector.broadcast %33 : f32 to vector<1x1x128xf32>
    %c0_10 = arith.constant 0 : index
    %c0_11 = arith.constant 0 : index
    %c0_12 = arith.constant 0 : index
    %35 = vector.load %arg3[%c0_10, %c0_11, %c0_12] : memref<1x1x128xf32, #tpu.memory_space<vmem>>, vector<1x1x128xf32>
    tpu.vector_store %arg3[%c0_10, %c0_11, %c0_12], %34 {strides = array<i32>} : memref<1x1x128xf32, #tpu.memory_space<vmem>>, vector<1x1x128xf32>,
    return
  }
  func.func @transform_0(%arg0: i32) -> (i32, i32) {
    %c0_i32 = arith.constant 0 : i32
    %c0_i32_0 = arith.constant 0 : i32
    return %arg0, %c0_i32 : i32, i32
  }
  func.func @transform_1(%arg0: i32) -> (i32, i32) {
    %c0_i32 = arith.constant 0 : i32
    %c0_i32_0 = arith.constant 0 : i32
    return %arg0, %c0_i32 : i32, i32
  }
  func.func @transform_2(%arg0: i32) -> (i32, i32, i32) {
    %c0_i32 = arith.constant 0 : i32
    %c0_i32_0 = arith.constant 0 : i32
    %c0_i32_1 = arith.constant 0 : i32
    return %arg0, %c0_i32, %c0_i32_0 : i32, i32, i32
  }
}

</mosaic_0001>

<bundles_post_ra>
// kernel: tpu_custom_call.1
= control target key start
LH: loop header
LB: loop body
LE: loop exit
PB: predicated region body
PF: predicated region fallthrough
CT: control target
= control target key end

     0   :  { %7 = vsyncpa [#allocation3], 0  ;;  %s196_s0 = inlined_call_operand.hbm [shape: f32[8,32], index: 0, kind: input, shape index: {}]   ;;  %s197_s1 = inlined_call_operand.hbm [shape: f32[8,32], index: 1, kind: input, shape index: {}]   ;;  %s198_s2 = inlined_call_operand.hbm [shape: f32[1,1,128], index: 2, kind: output, shape index: {}]  }
   0x1   :  { %8 = vsyncpa [#allocation6], 0 }
   0x2   :  { %9 = vsyncpa [#allocation4], 0  ;;  %s167_s9 = smov [#allocation2]   ;;  %s168_s11 = smov [#allocation5]  }
   0x3   :  { %s16_s10 = sshll.u32 %s167_s9, 4  ;;  %s26_s12 = sshll.u32 %s168_s11, 4  ;;  %s17_s10 = int_to_ptr.vmem [resolvable:$true] %s16_s10  ;;  %s27_s12 = int_to_ptr.vmem [resolvable:$true] %s26_s12 }
   0x4   :  { %s109_s13 = scalar_lea.vmem %s17_s10, 128  ;;  %p114_p1 = scmp.lt.s32.totalorder %s17_s10, %s17_s10 }
   0x5   :  { %p110_p0 = scmp.ne.s32.totalorder %s17_s10, %s109_s13  ;;  %p115_p2 = scmp.lt.s32.totalorder %s109_s13, %s109_s13 }
   0x7   :  { %p116_p3 = por %p115_p2, %p114_p1 }
   0x9   :  { %p117_p4 = pnand %p116_p3, %p110_p0 }
   0xb   :  { %120 = shalt.err (!%p117_p4)
}
   0xc   :  { %19 = dma.hbm_to_vmem [thread:$0]  %s196_s0, 128, %s17_s10, [#allocation3]  }
   0xd   :  { %s129_s16 = scalar_lea.vmem %s27_s12, 128  ;;  %p134_p6 = scmp.lt.s32.totalorder %s27_s12, %s27_s12 }
   0xe   :  { %p130_p5 = scmp.ne.s32.totalorder %s27_s12, %s129_s16  ;;  %p135_p7 = scmp.lt.s32.totalorder %s129_s16, %s129_s16 }
  0x10   :  { %p136_p8 = por %p135_p7, %p134_p6 }
  0x12   :  { %p137_p9 = pnand %p136_p8, %p130_p5 }
  0x14   :  { %140 = shalt.err (!%p137_p9)
}
  0x15   :  { %29 = dma.hbm_to_vmem [thread:$0]  %s197_s1, 128, %s27_s12, [#allocation6]  }
  0x16   :  { %161 = dma.done.wait [#allocation3], 128  }
  0x17   :  { %162 = vsyncadd [#allocation3], 4294967168 }
  0x18   :  { %163 = dma.done.wait [#allocation6], 128  }
  0x19   :  { %164 = vsyncadd [#allocation6], 4294967168  ;;  %v37_v0 = vld [vmem:[#allocation5] sm:$0xff]  ;;  %vm39_vm0 = vcmask 261120   ;;  %v36_v6 = vld [vmem:[#allocation2] sm:$0xff]  ;;  %vm63_vm1 = vcmask 7168  }
  0x1a   :  { %v38_v1 = vadd.f32 1.0, %v37_v0  ;;  %s169_s0 = smov [#allocation7]  }
  0x1b   :  { %s82_s1 = sshll.u32 %s169_s0, 4  ;;  %s83_s1 = int_to_ptr.vmem [resolvable:$true] %s82_s1 }
  0x1c   :  { %v40_v2 = vsel %vm39_vm0, %v38_v1, 0.0  ;;  %s141_s20 = scalar_lea.vmem %s83_s1, 16  ;;  %s145_s21 = scalar_lea.vmem %s83_s1, 32 }
  0x1d   :  { %41 = vadd.xlane.f32.xlu0 %v40_v2  ;;  %p142_p10 = scmp.ne.s32.totalorder %s83_s1, %s141_s20  ;;  %p146_p11 = scmp.lt.s32.totalorder %s83_s1, %s83_s1 }
  0x1e   :  { %p147_p12 = scmp.lt.s32.totalorder %s145_s21, %s141_s20 }
  0x20   :  { %p148_p13 = por %p147_p12, %p146_p11 }
  0x22   :  { %p149_p0 = pnand %p148_p13, %p142_p10 }
  0xa6   :  { %v42_v3 = vpop.xlane.xlu0 %41 }
  0xa7   :  { %97 = vrcp.f32 %v42_v3  ;;  %v44_v4 = vadd.f32 1.0, %v42_v3 }
  0xa9   :  { %99 = vrcp.f32 %v44_v4 }
  0xb4   :  { %v98_v5 = vpop.eup %97 }
  0xb5   :  { %v46_v7 = vmul.f32 %v98_v5, %v38_v1 }
  0xb6   :  { %v100_v11 = vpop.eup %99 }
  0xb7   :  { %v47_v8 = vsub.f32 %v36_v6, %v46_v7  ;;  %v49_v9 = vsub.f32 1.0, %v46_v7 }
  0xb9   :  { %v50_v10 = vmul.f32 %v49_v9, %v46_v7  ;;  %v48_v12 = vmul.f32 %v47_v8, %v47_v8 }
  0xbb   :  { %v51_v13 = vmul.f32 %v100_v11, %v50_v10 }
  0xbd   :  { %v52_v14 = vadd.f32 %v51_v13, %v48_v12 }
  0xbf   :  { %v53_v15 = vsel %vm39_vm0, %v52_v14, 0.0 }
  0xc0   :  { %54 = vadd.xlane.f32.xlu0 %v53_v15 }
 0x149   :  { %v55_v16 = vpop.xlane.xlu0 %54 }
 0x14a   :  { %v64_v17 = vsel %vm63_vm1, %v55_v16, 0.0 }
 0x14b   :  { %65 = vadd.xlane.f32.xlu1 %v64_v17 }
 0x1d4   :  { %v66_v18 = vpop.xlane.xlu1 %65 }
 0x1d5   :  { %v67_v19 = vrot.slane %v66_v18, 4 }
 0x1d7   :  { %v68_v20 = vadd.f32 %v67_v19, %v66_v18 }
 0x1d9   :  { %v69_v21 = vrot.slane %v68_v20, 2 }
 0x1db   :  { %v70_v22 = vadd.f32 %v69_v21, %v68_v20 }
 0x1dd   :  { %v71_v23 = vrot.slane %v70_v22, 1 }
 0x1df   :  { %v72_v24 = vadd.f32 %v71_v23, %v70_v22 }
 0x1e1   :  { %92 = vpush %v72_v24 }
 0x212   :  { %s93_s19 = spop %92 }
 0x213   :  { %v74_v25 = vstv %s93_s19 }
 0x214   :  { %75 = vst [vmem:[#allocation7] sm:$0x1] %v74_v25 }
 0x215   :  { %152 = shalt.err (!%p149_p0)
}
 0x216   :  { %85 = dma.vmem_to_hbm [thread:$0]  %s83_s1, 16, %s198_s2, [#allocation4]  }
 0x217   :  { %165 = dma.done.wait [#allocation4], 16  }
 0x218   :  { %166 = vsyncadd [#allocation4], 4294967280 }
 0x219   :  { %89 = vsyncpa [#allocation3], 1 }
 0x21a   :  { %90 = vsyncpa [#allocation6], 1 }
 0x21b   :  { %91 = vsyncpa [#allocation4], 1 }

</bundles_post_ra>
